<compile_context>
chip_gen: v7x
topology: tpu7x:2x2x1
jax: 0.10.0
libtpu: 0.0.40
codegen_flags: <defaults>
</compile_context>

<pallas_src>
import jax
import jax.numpy as jnp
from jax import lax
from jax.experimental import pallas as pl
from jax.experimental.pallas import tpu as pltpu

T = 10  # self.T in the torch module


def normal_kernel(xs_ref, xq_ref, std_ref, ax_ref, out_ref):
    # xs_ref : VMEM (B, n_way, n_shot, D)
    # xq_ref : VMEM (B, n_query, D)
    # std_ref: VMEM (B, n_query, n_way)   (logits already in std layout)
    # ax_ref : VMEM (T, 1, 1, 1)          (the T normal samples)
    # out_ref: VMEM (T, B, n_query, n_way)
    xs = xs_ref[...]
    proto = jnp.mean(xs, axis=2)                                    # (B, n_way, D)
    proto = proto * lax.rsqrt(
        jnp.maximum(jnp.sum(proto * proto, axis=-1, keepdims=True), 1e-24)
    )                                                               # F.normalize, eps^2 clamp

    q = xq_ref[...]                                                 # (B, n_query, D)
    q = q * lax.rsqrt(
        jnp.maximum(jnp.sum(q * q, axis=-1, keepdims=True), 1e-24)
    )

    # Batched cosine logits; contraction on the shared last (lane) dim, no .T.
    mean = jnp.einsum(
        "bqd,bwd->bqw", q, proto, preferred_element_type=jnp.float32
    ) * 10.0                                                        # (B, nq, nw)

    std = std_ref[...]                                              # (B, nq, nw)
    ax = ax_ref[...]                                                # (T, 1, 1, 1)

    # One fused broadcast-FMA + a single slab store for all T samples.
    out_ref[...] = mean[None] + std[None] * ax


def normal_forward(x_shot, x_query, logits, axis):
    """Returns the stacked [T, B, n_query, n_way] tensor of samples."""
    B, n_way, n_shot, D = x_shot.shape
    _, n_query, _ = x_query.shape

    std = jnp.transpose(logits, (1, 0, 2))                 # [B, n_query, n_way]
    ax = jnp.reshape(axis, (T, 1, 1, 1)).astype(jnp.float32)

    return pl.pallas_call(
        normal_kernel,
        out_shape=jax.ShapeDtypeStruct((T, B, n_query, n_way), jnp.float32),
        in_specs=[
            pl.BlockSpec(memory_space=pltpu.MemorySpace.VMEM) for _ in range(4)
        ],
        out_specs=pl.BlockSpec(memory_space=pltpu.MemorySpace.VMEM),
    )(x_shot, x_query, std, ax)


def normal_forward_list(x_shot, x_query, logits, axis):
    """torch-API parity: list of T arrays, each [B, n_query, n_way]."""
    out = normal_forward(x_shot, x_query, logits, axis)
    # Prefer consuming the stacked slab directly; slice lazily if a list is needed.
    return [out[t] for t in range(T)]


def normal_ref(x_shot, x_query, logits, axis):
    proto = x_shot.mean(axis=-2)
    proto = proto / jnp.maximum(
        jnp.linalg.norm(proto, axis=-1, keepdims=True), 1e-12
    )
    q = x_query / jnp.maximum(
        jnp.linalg.norm(x_query, axis=-1, keepdims=True), 1e-12
    )
    mean = jnp.einsum("bqd,bwd->bqw", q, proto) * 10.0
    std = jnp.transpose(logits, (1, 0, 2))
    return mean[None] + std[None] * axis[:, None, None, None]   # (T, B, nq, nw)


if __name__ == "__main__":
    key = jax.random.PRNGKey(0)
    k1, k2, k3, k4 = jax.random.split(key, 4)

    B, n_way, n_shot, n_query, D = 2, 4, 3, 8, 32
    x_shot = jax.random.normal(k1, (B, n_way, n_shot, D), dtype=jnp.float32)
    x_query = jax.random.normal(k2, (B, n_query, D), dtype=jnp.float32)
    logits = jax.random.normal(k3, (n_query, B, n_way), dtype=jnp.float32)
    # deterministic replacement for np.random.normal(size=T)
    axis = jax.random.normal(k4, (T,), dtype=jnp.float32)

    out = jax.block_until_ready(normal_forward(x_shot, x_query, logits, axis))
    ref = normal_ref(x_shot, x_query, logits, axis)

    assert out.shape == (T, B, n_query, n_way)
    assert jnp.allclose(out, ref, atol=1e-3, rtol=1e-3), "mismatch vs reference"

    # torch-style list API check (each element [B, n_query, n_way])
    outs_list = normal_forward_list(x_shot, x_query, logits, axis)
    assert len(outs_list) == T and outs_list[0].shape == (B, n_query, n_way)

    print("KERNEL_OK")
</pallas_src>

<mosaic_0001>
module attributes {stable_mosaic.version = 11 : i64} {
  func.func @normal_kernel(%arg0: memref<2x4x3x32xf32, #tpu.memory_space<vmem>>, %arg1: memref<2x8x32xf32, #tpu.memory_space<vmem>>, %arg2: memref<2x8x4xf32, #tpu.memory_space<vmem>>, %arg3: memref<10x1x1x1xf32, #tpu.memory_space<vmem>>, %arg4: memref<10x2x8x4xf32, #tpu.memory_space<vmem>>) attributes {dimension_semantics = [], scalar_prefetch = 0 : i64, scratch_operands = 0 : i64, tpu.core_type = #tpu.core_type<tc>} {
    %c0 = arith.constant 0 : index
    %c0_0 = arith.constant 0 : index
    %c0_1 = arith.constant 0 : index
    %c0_2 = arith.constant 0 : index
    %0 = vector.load %arg0[%c0, %c0_0, %c0_1, %c0_2] : memref<2x4x3x32xf32, #tpu.memory_space<vmem>>, vector<2x4x3x32xf32>
    %cst = arith.constant dense<0.000000e+00> : vector<2x4x32xf32>
    %1 = vector.multi_reduction <add>, %0, %cst [2] : vector<2x4x3x32xf32> to vector<2x4x32xf32>
    %cst_3 = arith.constant 3.000000e+00 : f32
    %2 = vector.broadcast %cst_3 : f32 to vector<2x4x32xf32>
    %3 = arith.divf %1, %2 : vector<2x4x32xf32>
    %4 = arith.mulf %3, %3 : vector<2x4x32xf32>
    %cst_4 = arith.constant dense<0.000000e+00> : vector<2x4xf32>
    %5 = vector.multi_reduction <add>, %4, %cst_4 [2] : vector<2x4x32xf32> to vector<2x4xf32>
    %6 = vector.shape_cast %5 : vector<2x4xf32> to vector<2x4x1xf32>
    %cst_5 = arith.constant 1.000000e-24 : f32
    %7 = vector.broadcast %cst_5 : f32 to vector<2x4x1xf32>
    %8 = arith.maximumf %6, %7 : vector<2x4x1xf32>
    %9 = math.rsqrt %8 : vector<2x4x1xf32>
    %10 = vector.broadcast %9 : vector<2x4x1xf32> to vector<2x4x32xf32>
    %11 = arith.mulf %3, %10 : vector<2x4x32xf32>
    %c0_6 = arith.constant 0 : index
    %c0_7 = arith.constant 0 : index
    %c0_8 = arith.constant 0 : index
    %12 = vector.load %arg1[%c0_6, %c0_7, %c0_8] : memref<2x8x32xf32, #tpu.memory_space<vmem>>, vector<2x8x32xf32>
    %13 = arith.mulf %12, %12 : vector<2x8x32xf32>
    %cst_9 = arith.constant dense<0.000000e+00> : vector<2x8xf32>
    %14 = vector.multi_reduction <add>, %13, %cst_9 [2] : vector<2x8x32xf32> to vector<2x8xf32>
    %15 = vector.shape_cast %14 : vector<2x8xf32> to vector<2x8x1xf32>
    %cst_10 = arith.constant 1.000000e-24 : f32
    %16 = vector.broadcast %cst_10 : f32 to vector<2x8x1xf32>
    %17 = arith.maximumf %15, %16 : vector<2x8x1xf32>
    %18 = math.rsqrt %17 : vector<2x8x1xf32>
    %19 = vector.broadcast %18 : vector<2x8x1xf32> to vector<2x8x32xf32>
    %20 = arith.mulf %12, %19 : vector<2x8x32xf32>
    "tpu.trace_start"() <{level = 10 : i32, message = "bqd,bwd->bqw"}> : () -> ()
    %cst_11 = arith.constant dense<0.000000e+00> : vector<2x8x4xf32>
    %21 = tpu.matmul %20, %11, %cst_11 {dimension_numbers = #tpu.dot_dimension_numbers<[2], [2], [1], [1], [0, 0, 0, 1, 1, 1], [0], [0]>} : vector<2x8x32xf32>, vector<2x4x32xf32>, vector<2x8x4xf32> -> vector<2x8x4xf32>
    "tpu.trace_stop"() : () -> ()
    %cst_12 = arith.constant 1.000000e+01 : f32
    %22 = vector.broadcast %cst_12 : f32 to vector<2x8x4xf32>
    %23 = arith.mulf %21, %22 : vector<2x8x4xf32>
    %c0_13 = arith.constant 0 : index
    %c0_14 = arith.constant 0 : index
    %c0_15 = arith.constant 0 : index
    %24 = vector.load %arg2[%c0_13, %c0_14, %c0_15] : memref<2x8x4xf32, #tpu.memory_space<vmem>>, vector<2x8x4xf32>
    %c0_16 = arith.constant 0 : index
    %c0_17 = arith.constant 0 : index
    %c0_18 = arith.constant 0 : index
    %c0_19 = arith.constant 0 : index
    %25 = vector.load %arg3[%c0_16, %c0_17, %c0_18, %c0_19] : memref<10x1x1x1xf32, #tpu.memory_space<vmem>>, vector<10x1x1x1xf32>
    %26 = vector.shape_cast %23 : vector<2x8x4xf32> to vector<1x2x8x4xf32>
    %27 = vector.shape_cast %24 : vector<2x8x4xf32> to vector<1x2x8x4xf32>
    %28 = vector.broadcast %27 : vector<1x2x8x4xf32> to vector<10x2x8x4xf32>
    %29 = vector.broadcast %25 : vector<10x1x1x1xf32> to vector<10x2x8x4xf32>
    %30 = arith.mulf %28, %29 : vector<10x2x8x4xf32>
    %31 = vector.broadcast %26 : vector<1x2x8x4xf32> to vector<10x2x8x4xf32>
    %32 = arith.addf %31, %30 : vector<10x2x8x4xf32>
    %c0_20 = arith.constant 0 : index
    %c0_21 = arith.constant 0 : index
    %c0_22 = arith.constant 0 : index
    %c0_23 = arith.constant 0 : index
    %33 = vector.load %arg4[%c0_20, %c0_21, %c0_22, %c0_23] : memref<10x2x8x4xf32, #tpu.memory_space<vmem>>, vector<10x2x8x4xf32>
    tpu.vector_store %arg4[%c0_20, %c0_21, %c0_22, %c0_23], %32 {strides = array<i32>} : memref<10x2x8x4xf32, #tpu.memory_space<vmem>>, vector<10x2x8x4xf32>,
    return
  }
}

</mosaic_0001>

<bundles_post_ra>
// kernel: tpu_custom_call.1
= control target key start
LH: loop header
LB: loop body
LE: loop exit
PB: predicated region body
PF: predicated region fallthrough
CT: control target
= control target key end

     0   :  { %vm25_vm0 = vcmask 256000   ;;  %vm107_vm1 = vcmask 1041409   ;;  %vm109_vm2 = vcmask 1042434   ;;  %vm111_vm3 = vcmask 1043459   ;;  %s802_s0 = inlined_call_operand.vmem [shape: f32[2,4,3,32], index: 0, kind: input, shape index: {}]   ;;  %s803_s1 = inlined_call_operand.vmem [shape: f32[2,8,32], index: 1, kind: input, shape index: {}]   ;;  %s804_s3 = inlined_call_operand.vmem [shape: f32[10,1,1,1], index: 3, kind: input, shape index: {}]   ;;  %s805_s2 = inlined_call_operand.vmem [shape: f32[2,8,4], index: 2, kind: input, shape index: {}]   ;;  %s806_s4 = inlined_call_operand.vmem [shape: f32[10,2,8,4], index: 4, kind: output, shape index: {}]  }
   0x1   :  { %v17_v0 = vld [vmem:[%s802_s0] sm:$0x7]  ;;  %v18_v1 = vld [vmem:[%s802_s0 + $0x4] sm:$0x7]  ;;  %v19_v2 = vld [vmem:[%s802_s0 + $0x8] sm:$0x7] }
   0x2   :  { %v20_v3 = vld [vmem:[%s802_s0 + $0xc] sm:$0x7]  ;;  %v26_v4 = vsel %vm25_vm0, %v17_v0, 0.0  ;;  %v33_v5 = vsel %vm25_vm0, %v18_v1, 0.0  ;;  %v40_v6 = vsel %vm25_vm0, %v19_v2, 0.0  ;;  %vm118_vm4 = vcmask 257024  }
   0x3   :  { %v27_v7 = vrot.slane %v26_v4, 4  ;;  %v34_v8 = vrot.slane %v33_v5, 4  ;;  %v41_v9 = vrot.slane %v40_v6, 4  ;;  %v47_v10 = vsel %vm25_vm0, %v20_v3, 0.0  ;;  %v21_v11 = vld [vmem:[%s802_s0 + $0x10] sm:$0x7] }
   0x4   :  { %v48_v12 = vrot.slane %v47_v10, 4  ;;  %v22_v13 = vld [vmem:[%s802_s0 + $0x14] sm:$0x7]  ;;  %v23_v14 = vld [vmem:[%s802_s0 + $0x18] sm:$0x7]  ;;  %v54_v15 = vsel %vm25_vm0, %v21_v11, 0.0 }
   0x5   :  { %v28_v16 = vadd.f32 %v27_v7, %v26_v4  ;;  %v35_v17 = vadd.f32 %v34_v8, %v33_v5  ;;  %v42_v18 = vadd.f32 %v41_v9, %v40_v6  ;;  %v24_v19 = vld [vmem:[%s802_s0 + $0x1c] sm:$0x7]  ;;  %v55_v20 = vrot.slane %v54_v15, 4  ;;  %v621_v1 = vld [vmem:[%s803_s1] sm:$0xff] }
   0x6   :  { %v49_v21 = vadd.f32 %v48_v12, %v47_v10  ;;  %v61_v22 = vsel %vm25_vm0, %v22_v13, 0.0  ;;  %v68_v23 = vsel %vm25_vm0, %v23_v14, 0.0  ;;  %v75_v24 = vsel %vm25_vm0, %v24_v19, 0.0  ;;  %v636_v10 = vld [vmem:[%s803_s1 + $0x8] sm:$0xff] }
   0x7   :  { %v29_v25 = vrot.slane %v28_v16, 2  ;;  %v36_v26 = vrot.slane %v35_v17, 2  ;;  %v43_v27 = vrot.slane %v42_v18, 2  ;;  %v56_v28 = vadd.f32 %v55_v20, %v54_v15 }
   0x8   :  { %v50_v29 = vrot.slane %v49_v21, 2  ;;  %v62_v30 = vrot.slane %v61_v22, 4  ;;  %v69_v31 = vrot.slane %v68_v23, 4  ;;  %v76_v32 = vrot.slane %v75_v24, 4 }
   0x9   :  { %v30_v33 = vadd.f32 %v29_v25, %v28_v16  ;;  %v37_v34 = vadd.f32 %v36_v26, %v35_v17  ;;  %v44_v35 = vadd.f32 %v43_v27, %v42_v18  ;;  %v57_v36 = vrot.slane %v56_v28, 2 }
   0xa   :  { %v51_v37 = vadd.f32 %v50_v29, %v49_v21  ;;  %v63_v38 = vadd.f32 %v62_v30, %v61_v22  ;;  %v70_v39 = vadd.f32 %v69_v31, %v68_v23  ;;  %v77_v40 = vadd.f32 %v76_v32, %v75_v24  ;;  %v514_v32 = vld [vmem:[%s804_s3 + $0x1] ss:$0 sm:$0xff] }
   0xb   :  { %v31_v41 = vrot.slane %v30_v33, 1  ;;  %v38_v42 = vrot.slane %v37_v34, 1  ;;  %v45_v43 = vrot.slane %v44_v35, 1  ;;  %v58_v44 = vadd.f32 %v57_v36, %v56_v28  ;;  %v516_v36 = vld [vmem:[%s804_s3 + $0x3] ss:$0 sm:$0xff] }
   0xc   :  { %v52_v45 = vrot.slane %v51_v37, 1  ;;  %v64_v46 = vrot.slane %v63_v38, 2  ;;  %v71_v47 = vrot.slane %v70_v39, 2  ;;  %v78_v48 = vrot.slane %v77_v40, 2 }
   0xd   :  { %v32_v49 = vadd.f32 %v31_v41, %v30_v33  ;;  %v39_v50 = vadd.f32 %v38_v42, %v37_v34  ;;  %v46_v51 = vadd.f32 %v45_v43, %v44_v35  ;;  %v59_v52 = vrot.slane %v58_v44, 1  ;;  %v515_v33 = vld [vmem:[%s804_s3 + $0x2] ss:$0 sm:$0xff]  ;;  %v513_v34 = vld [vmem:[%s804_s3] ss:$0 sm:$0xff] }
   0xe   :  { %v53_v53 = vadd.f32 %v52_v45, %v51_v37  ;;  %v65_v54 = vadd.f32 %v64_v46, %v63_v38  ;;  %v72_v55 = vadd.f32 %v71_v47, %v70_v39  ;;  %v79_v56 = vadd.f32 %v78_v48, %v77_v40  ;;  %v522_v35 = vld [vmem:[%s804_s3 + $0x9] ss:$0 sm:$0xff]  ;;  %v517_v37 = vld [vmem:[%s804_s3 + $0x4] ss:$0 sm:$0xff]  ;;  %v518_v38 = vld [vmem:[%s804_s3 + $0x5] ss:$0 sm:$0xff] }
   0xf   :  { %v610_v57 = vmul.f32 0.33333334, %v32_v49  ;;  %v612_v58 = vmul.f32 0.33333334, %v39_v50  ;;  %v614_v59 = vmul.f32 0.33333334, %v46_v51  ;;  %v60_v60 = vadd.f32 %v59_v52, %v58_v44 }
  0x10   :  { %v616_v61 = vmul.f32 0.33333334, %v53_v53  ;;  %v66_v62 = vrot.slane %v65_v54, 1  ;;  %v73_v63 = vrot.slane %v72_v55, 1  ;;  %v80_v0 = vrot.slane %v79_v56, 1 }
  0x11   :  { %v91_v2 = vmul.f32 %v610_v57, %v610_v57  ;;  %v92_v3 = vmul.f32 %v612_v58, %v612_v58  ;;  %v93_v4 = vmul.f32 %v614_v59, %v614_v59  ;;  %v629_v5 = vmul.f32 0.33333334, %v60_v60  ;;  %v519_v39 = vld [vmem:[%s804_s3 + $0x6] ss:$0 sm:$0xff]  ;;  %v520_v40 = vld [vmem:[%s804_s3 + $0x7] ss:$0 sm:$0xff] }
  0x12   :  { %v94_v6 = vmul.f32 %v616_v61, %v616_v61  ;;  %v67_v7 = vadd.f32 %v66_v62, %v65_v54  ;;  %v74_v8 = vadd.f32 %v73_v63, %v72_v55  ;;  %v81_v9 = vadd.f32 %v80_v0, %v79_v56  ;;  %v521_v41 = vld [vmem:[%s804_s3 + $0x8] ss:$0 sm:$0xff] }
  0x13   :  { %v108_v11 = vsel %vm107_vm1, %v92_v3, %v91_v2  ;;  %v95_v12 = vmul.f32 %v629_v5, %v629_v5  ;;  %v155_v13 = vmul.f32 %v621_v1, %v621_v1  ;;  %vm157_vm5 = vcmask 261120  }
  0x14   :  { %v110_v14 = vsel %vm109_vm2, %v93_v4, %v108_v11  ;;  %v644_v15 = vmul.f32 0.33333334, %v67_v7  ;;  %v646_v16 = vmul.f32 0.33333334, %v74_v8  ;;  %v648_v17 = vmul.f32 0.33333334, %v81_v9 }
  0x15   :  { %v112_v18 = vsel %vm111_vm3, %v94_v6, %v110_v14  ;;  %v158_v19 = vsel %vm157_vm5, %v155_v13, 0.0  ;;  %v156_v20 = vmul.f32 %v636_v10, %v636_v10  ;;  %v550_v30 = vmov 0.0  }
  0x16   :  { %v119_v21 = vsel %vm118_vm4, %v112_v18, 0.0  ;;  %v96_v22 = vmul.f32 %v644_v15, %v644_v15  ;;  %v97_v23 = vmul.f32 %v646_v16, %v646_v16  ;;  %v98_v24 = vmul.f32 %v648_v17, %v648_v17  ;;  %159 = vadd.xlane.f32.xlu1 %v158_v19  ;;  %527 = vmatprep.subr.mxu0 %v550_v30 }
  0x17   :  { %120 = vadd.xlane.f32.xlu0 %v119_v21  ;;  %v161_v25 = vsel %vm157_vm5, %v156_v20, 0.0  ;;  %532 = vmatprep.subr.mxu1 %v550_v30  ;;  %vm551_vm6 = vmmov 0   ;;  %v552_v31 = vmov 0   ;;  %vm484_vm7 = vcmask 31744  }
  0x18   :  { %v113_v26 = vsel %vm107_vm1, %v96_v22, %v95_v12  ;;  %529 = vmatprep.mubr.msk.f32.mxu0 %vm551_vm6, %v550_v30  ;;  %534 = vmatprep.mubr.msk.f32.mxu1 %vm551_vm6, %v550_v30 }
  0x19   :  { %v114_v27 = vsel %vm109_vm2, %v97_v23, %v113_v26  ;;  %541 = vset.pattern.permute.xlu1 %v552_v31  ;;  %540 = vset.pattern.permute.xlu0 %v552_v31 }
  0x1a   :  { %v115_v28 = vsel %vm111_vm3, %v98_v24, %v114_v27  ;;  %162 = vadd.xlane.f32.xlu1 %v161_v25  ;;  %v342_v27 = vld [vmem:[%s805_s2] sm:$0xff] }
  0x1b   :  { %v122_v29 = vsel %vm118_vm4, %v115_v28, 0.0 }
  0x1c   :  { %123 = vadd.xlane.f32.xlu0 %v122_v29 }
  0x2b   :  { %409 = vperm.xlu1 %541, %v514_v32  }
  0x2f   :  { %413 = vperm.xlu1 %541, %v515_v33  }
  0x32   :  { %405 = vperm.xlu0 %540, %v513_v34  }
  0x33   :  { %417 = vperm.xlu1 %541, %v516_v36  }
  0x36   :  { %441 = vperm.xlu0 %540, %v522_v35  }
  0x37   :  { %421 = vperm.xlu1 %541, %v517_v37  }
  0x3b   :  { %425 = vperm.xlu1 %541, %v518_v38  }
  0x3f   :  { %429 = vperm.xlu1 %541, %v519_v39  }
  0x43   :  { %433 = vperm.xlu1 %541, %v520_v40  }
  0x47   :  { %437 = vperm.xlu1 %541, %v521_v41  }
  0xa3   :  { %v160_v44 = vpop.xlane.xlu1 %159 }
  0xa4   :  { %v121_v42 = vpop.xlane.xlu0 %120  ;;  %v164_v46 = vmax.f32 %v160_v44, 1e-24 }
  0xa5   :  { %v125_v43 = vmax.f32 %v121_v42, 1e-24 }
  0xa7   :  { %542 = vrsqrt.f32 %v125_v43  ;;  %v163_v48 = vpop.xlane.xlu1 %162 }
  0xa8   :  { %v165_v49 = vmax.f32 %v163_v48, 1e-24 }
  0xa9   :  { %v124_v45 = vpop.xlane.xlu0 %123 }
  0xaa   :  { %v126_v47 = vmax.f32 %v124_v45, 1e-24 }
  0xac   :  { %544 = vrsqrt.f32 %v126_v47 }
  0xad   :  { %546 = vrsqrt.f32 %v164_v46 }
  0xae   :  { %548 = vrsqrt.f32 %v165_v49 }
  0xb1   :  { %v543_v50 = vpop.eup %542  ;;  %v406_v25 = vpop.permute.xlu0 %405 }
  0xb2   :  { %v131_v51 = vrot.slane %v543_v50, 1  ;;  %v132_v52 = vrot.slane %v543_v50, 2  ;;  %v133_v53 = vrot.slane %v543_v50, 3  ;;  %v145_v62 = vmul.f32 %v543_v50, %v610_v57 }
  0xb3   :  { %v444_v30 = vmul.f32 %v406_v25, %v342_v27 }
  0xb4   :  { %v146_v54 = vmul.f32 %v131_v51, %v612_v58  ;;  %v147_v55 = vmul.f32 %v132_v52, %v614_v59  ;;  %v148_v56 = vmul.f32 %v133_v53, %v616_v61 }
  0xb5   :  { %v442_v28 = vpop.permute.xlu0 %441 }
  0xb6   :  { %v545_v60 = vpop.eup %544  ;;  %v174_v63 = vrot.slane %v146_v54, 7  ;;  %v176_v0 = vrot.slane %v147_v55, 6  ;;  %v178_v8 = vrot.slane %v148_v56, 5  ;;  %v462_v39 = vmul.f32 %v442_v28, %v342_v27 }
  0xb7   :  { %v547_v2 = vpop.eup %546  ;;  %v134_v3 = vrot.slane %v545_v60, 1  ;;  %v135_v4 = vrot.slane %v545_v60, 2  ;;  %v136_v6 = vrot.slane %v545_v60, 3  ;;  %v149_v12 = vmul.f32 %v545_v60, %v629_v5 }
  0xb8   :  { %v175_v7 = vsel %vm107_vm1, %v174_v63, %v145_v62  ;;  %v168_v57 = vmul.f32 %v547_v2, %v621_v1  ;;  %v549_v18 = vpop.eup %548  ;;  %v410_v1 = vpop.permute.xlu1 %409 }
  0xb9   :  { %v177_v9 = vsel %vm109_vm2, %v176_v0, %v175_v7  ;;  %v150_v58 = vmul.f32 %v134_v3, %v644_v15  ;;  %v151_v59 = vmul.f32 %v135_v4, %v646_v16  ;;  %v152_v61 = vmul.f32 %v136_v6, %v648_v17 }
  0xba   :  { %v179_v11 = vsel %vm111_vm3, %v178_v8, %v177_v9  ;;  %v169_v17 = vmul.f32 %v549_v18, %v636_v10  ;;  %v343_v10 = vld [vmem:[%s805_s2 + $0x8] sm:$0xff]  ;;  %v446_v31 = vmul.f32 %v410_v1, %v342_v27 }
  0xbb   :  { %528 = vmatpush3.xpose.msk.msra.mxu0 %vm157_vm5, %v179_v11  ;;  %v259_v13 = vrot.slane %v150_v58, 7  ;;  %v261_v14 = vrot.slane %v151_v59, 6  ;;  %v263_v20 = vrot.slane %v152_v61, 5  ;;  %v447_v32 = vmul.f32 %v410_v1, %v343_v10 }
  0xbc   :  { %v414_v5 = vpop.permute.xlu1 %413  ;;  %v445_v53 = vmul.f32 %v406_v25, %v343_v10  ;;  %v463_v7 = vmul.f32 %v442_v28, %v343_v10 }
  0xbd   :  { %v260_v19 = vsel %vm107_vm1, %v259_v13, %v149_v12  ;;  %v448_v33 = vmul.f32 %v414_v5, %v342_v27  ;;  %v449_v52 = vmul.f32 %v414_v5, %v343_v10 }
  0xbe   :  { %530 = vmatmul.mubr.msk.f32.vlgmr.msra.gmra.mrb[0].mxu0 %vm157_vm5, %v168_v57  ;;  %v262_v15 = vsel %vm109_vm2, %v261_v14, %v260_v19 }
  0xbf   :  { %v264_v16 = vsel %vm111_vm3, %v263_v20, %v262_v15 }
  0xc0   :  { %533 = vmatpush3.xpose.msk.msra.mxu1 %vm157_vm5, %v264_v16  ;;  %v418_v21 = vpop.permute.xlu1 %417 }
  0xc1   :  { %v450_v34 = vmul.f32 %v418_v21, %v342_v27  ;;  %v451_v60 = vmul.f32 %v418_v21, %v343_v10 }
  0xc3   :  { %535 = vmatmul.mubr.msk.f32.vlgmr.msra.gmra.mrb[0].mxu1 %vm157_vm5, %v169_v17 }
  0xc4   :  { %v422_v22 = vpop.permute.xlu1 %421 }
  0xc5   :  { %v452_v36 = vmul.f32 %v422_v22, %v342_v27  ;;  %v453_v62 = vmul.f32 %v422_v22, %v343_v10 }
  0xc8   :  { %v426_v23 = vpop.permute.xlu1 %425 }
  0xc9   :  { %v454_v37 = vmul.f32 %v426_v23, %v342_v27  ;;  %v455_v63 = vmul.f32 %v426_v23, %v343_v10 }
  0xcc   :  { %v430_v24 = vpop.permute.xlu1 %429 }
  0xcd   :  { %v456_v41 = vmul.f32 %v430_v24, %v342_v27  ;;  %v457_v3 = vmul.f32 %v430_v24, %v343_v10 }
  0xd0   :  { %v434_v26 = vpop.permute.xlu1 %433 }
  0xd1   :  { %v458_v42 = vmul.f32 %v434_v26, %v342_v27  ;;  %v459_v4 = vmul.f32 %v434_v26, %v343_v10 }
  0xd4   :  { %v438_v29 = vpop.permute.xlu1 %437 }
  0xd5   :  { %v460_v43 = vmul.f32 %v438_v29, %v342_v27  ;;  %v461_v6 = vmul.f32 %v438_v29, %v343_v10 }
 0x191   :  { %v251_v35 = vpop.f32.mrb[0].mxu0 }
 0x192   :  { %v340_v38 = vmul.f32 10.0, %v251_v35  ;;  %v531_v40 = vpop.f32.mrb[1].mxu0 }
 0x194   :  { %v464_v44 = vadd.f32 %v444_v30, %v340_v38  ;;  %v466_v45 = vadd.f32 %v446_v31, %v340_v38  ;;  %v468_v46 = vadd.f32 %v448_v33, %v340_v38  ;;  %v470_v47 = vadd.f32 %v450_v34, %v340_v38 }
 0x195   :  { %v472_v48 = vadd.f32 %v452_v36, %v340_v38  ;;  %v474_v49 = vadd.f32 %v454_v37, %v340_v38  ;;  %v476_v50 = vadd.f32 %v456_v41, %v340_v38  ;;  %v478_v51 = vadd.f32 %v458_v42, %v340_v38 }
 0x196   :  { %v480_v54 = vadd.f32 %v460_v43, %v340_v38  ;;  %485 = vst.msk [vmem:[%s806_s4] sm:$0xff] %vm484_vm7, %v464_v44  ;;  %487 = vst.msk [vmem:[%s806_s4 + $0x10] sm:$0xff] %vm484_vm7, %v466_v45  ;;  %v482_v55 = vadd.f32 %v462_v39, %v340_v38  ;;  %v336_v56 = vpop.f32.mrb[0].mxu1 }
 0x197   :  { %489 = vst.msk [vmem:[%s806_s4 + $0x20] sm:$0xff] %vm484_vm7, %v468_v46  ;;  %491 = vst.msk [vmem:[%s806_s4 + $0x30] sm:$0xff] %vm484_vm7, %v470_v47  ;;  %v341_v0 = vmul.f32 10.0, %v336_v56  ;;  %v536_v2 = vpop.f32.mrb[1].mxu1 }
 0x198   :  { %493 = vst.msk [vmem:[%s806_s4 + $0x40] sm:$0xff] %vm484_vm7, %v472_v48  ;;  %495 = vst.msk [vmem:[%s806_s4 + $0x50] sm:$0xff] %vm484_vm7, %v474_v49 }
 0x199   :  { %497 = vst.msk [vmem:[%s806_s4 + $0x60] sm:$0xff] %vm484_vm7, %v476_v50  ;;  %499 = vst.msk [vmem:[%s806_s4 + $0x70] sm:$0xff] %vm484_vm7, %v478_v51  ;;  %v465_v8 = vadd.f32 %v445_v53, %v341_v0  ;;  %v467_v9 = vadd.f32 %v447_v32, %v341_v0  ;;  %v469_v58 = vadd.f32 %v449_v52, %v341_v0 }
 0x19a   :  { %501 = vst.msk [vmem:[%s806_s4 + $0x80] sm:$0xff] %vm484_vm7, %v480_v54  ;;  %503 = vst.msk [vmem:[%s806_s4 + $0x90] sm:$0xff] %vm484_vm7, %v482_v55  ;;  %v471_v59 = vadd.f32 %v451_v60, %v341_v0  ;;  %v473_v61 = vadd.f32 %v453_v62, %v341_v0  ;;  %v475_v11 = vadd.f32 %v455_v63, %v341_v0 }
 0x19b   :  { %v477_v57 = vadd.f32 %v457_v3, %v341_v0  ;;  %v479_v12 = vadd.f32 %v459_v4, %v341_v0  ;;  %v481_v13 = vadd.f32 %v461_v6, %v341_v0  ;;  %v483_v14 = vadd.f32 %v463_v7, %v341_v0  ;;  %486 = vst.msk [vmem:[%s806_s4 + $0x8] sm:$0xff] %vm484_vm7, %v465_v8 }
 0x19c   :  { %488 = vst.msk [vmem:[%s806_s4 + $0x18] sm:$0xff] %vm484_vm7, %v467_v9  ;;  %490 = vst.msk [vmem:[%s806_s4 + $0x28] sm:$0xff] %vm484_vm7, %v469_v58 }
 0x19d   :  { %492 = vst.msk [vmem:[%s806_s4 + $0x38] sm:$0xff] %vm484_vm7, %v471_v59  ;;  %494 = vst.msk [vmem:[%s806_s4 + $0x48] sm:$0xff] %vm484_vm7, %v473_v61 }
 0x19e   :  { %496 = vst.msk [vmem:[%s806_s4 + $0x58] sm:$0xff] %vm484_vm7, %v475_v11  ;;  %498 = vst.msk [vmem:[%s806_s4 + $0x68] sm:$0xff] %vm484_vm7, %v477_v57 }
 0x19f   :  { %500 = vst.msk [vmem:[%s806_s4 + $0x78] sm:$0xff] %vm484_vm7, %v479_v12  ;;  %502 = vst.msk [vmem:[%s806_s4 + $0x88] sm:$0xff] %vm484_vm7, %v481_v13 }
 0x1a0   :  { %504 = vst.msk [vmem:[%s806_s4 + $0x98] sm:$0xff] %vm484_vm7, %v483_v14 }

</bundles_post_ra>
